<compile_context>
chip_gen: v7x
topology: tpu7x:2x2x1
jax: 0.10.0
libtpu: 0.0.40
codegen_flags: <defaults>
</compile_context>

<pallas_src>
from functools import partial

import jax
import jax.numpy as jnp
from jax.experimental import pallas as pl
from jax.experimental.pallas import tpu as pltpu


# --------------------------------------------------------------------------- #
# VMEM budget (generation-aware)
# --------------------------------------------------------------------------- #
def _vmem_budget_bytes():
    """~60% of physical VMEM (v5e/v6e: 128 MiB -> ~76 MiB, v7x: 64 MiB -> ~38 MiB)."""
    cap = None
    try:
        info = pltpu.get_tpu_info()
        cap = getattr(info, "vmem_capacity_bytes", None)
    except Exception:
        cap = None
    if not isinstance(cap, int) or cap <= 0:
        cap = 64 * 1024 * 1024  # conservative fallback = v7x physical VMEM
    return int(cap * 0.6)


# --------------------------------------------------------------------------- #
# Fused kernel: squeeze + excite + scale on a resident (tb, C, L) stripe
# --------------------------------------------------------------------------- #
def _se_fused_kernel(x_ref, w1_ref, w2_ref, o_ref):
    # Squeeze: sum over L (lane axis) in f32. The 1/L of the adaptive-avg-pool
    # mean is folded into w1 by the wrapper, so padded zero columns are harmless.
    pooled = jnp.sum(x_ref[...], axis=-1, dtype=jnp.float32)             # (tb, C)
    # Excite: tiny MLP, runs once per B-stripe (negligible MXU occupancy).
    h = jnp.maximum(
        jnp.dot(pooled, w1_ref[...], preferred_element_type=jnp.float32), 0.0)
    g = jax.nn.sigmoid(
        jnp.dot(h, w2_ref[...], preferred_element_type=jnp.float32))     # (tb, C)
    # Single lane->sublane relayout of the tiny gate per stripe; the multiply is
    # then a pure lane-broadcast over the resident (tb, C, L) block.
    g = g.astype(o_ref.dtype)[:, :, None]                                # (tb, C, 1)
    o_ref[...] = x_ref[...] * g


def _se_fused(x, w1_t, w2_t, tb, vmem_limit):
    B, C, L = x.shape
    Cr = w1_t.shape[1]
    grid = (B // tb,)
    return pl.pallas_call(
        _se_fused_kernel,
        out_shape=jax.ShapeDtypeStruct((B, C, L), x.dtype),
        grid_spec=pltpu.PrefetchScalarGridSpec(
            num_scalar_prefetch=0,
            grid=grid,
            in_specs=[
                pl.BlockSpec((tb, C, L), lambda b: (b, 0, 0)),   # x stripe
                pl.BlockSpec((C, Cr), lambda b: (0, 0)),         # w1_t (resident)
                pl.BlockSpec((Cr, C), lambda b: (0, 0)),         # w2_t (resident)
            ],
            out_specs=pl.BlockSpec((tb, C, L), lambda b: (b, 0, 0)),
        ),
        compiler_params=pltpu.CompilerParams(
            dimension_semantics=("parallel",),
            vmem_limit_bytes=vmem_limit,
        ),
    )(x, w1_t, w2_t)


# --------------------------------------------------------------------------- #
# Fallback (full-L stripe too large for VMEM): stream L tiles, two passes
# --------------------------------------------------------------------------- #
def _se_gate_kernel(x_ref, w1_ref, w2_ref, gate_ref, acc_ref):
    """Pass 1: sum-over-L across L tiles + tiny excitation MLP on the last tile."""
    l = pl.program_id(1)

    @pl.when(l == 0)
    def _init():
        acc_ref[...] = jnp.zeros_like(acc_ref)

    acc_ref[...] += jnp.sum(x_ref[...], axis=-1, dtype=jnp.float32)

    @pl.when(l == pl.num_programs(1) - 1)
    def _finalize():
        pooled = acc_ref[...]                                            # (tb, C)
        h = jnp.maximum(
            jnp.dot(pooled, w1_ref[...], preferred_element_type=jnp.float32), 0.0)
        g = jax.nn.sigmoid(
            jnp.dot(h, w2_ref[...], preferred_element_type=jnp.float32))
        # Emit with a trailing singleton so pass 2 is a pure lane-broadcast.
        gate_ref[...] = g[:, :, None]                                    # (tb, C, 1)


def _se_scale_kernel(x_ref, gate_ref, o_ref):
    """Pass 2: lane-dense broadcast-scale in x's native dtype (no relayout)."""
    o_ref[...] = x_ref[...] * gate_ref[...].astype(x_ref.dtype)


def _se_two_pass(x, w1_t, w2_t, tb, tl, vmem_limit):
    B, C, L = x.shape  # L is already a multiple of tl
    Cr = w1_t.shape[1]
    grid = (B // tb, L // tl)

    gate = pl.pallas_call(
        _se_gate_kernel,
        out_shape=jax.ShapeDtypeStruct((B, C, 1), jnp.float32),
        grid_spec=pltpu.PrefetchScalarGridSpec(
            num_scalar_prefetch=0,
            grid=grid,
            in_specs=[
                pl.BlockSpec((tb, C, tl), lambda b, l: (b, 0, l)),
                pl.BlockSpec((C, Cr), lambda b, l: (0, 0)),
                pl.BlockSpec((Cr, C), lambda b, l: (0, 0)),
            ],
            out_specs=pl.BlockSpec((tb, C, 1), lambda b, l: (b, 0, 0)),
            scratch_shapes=[pltpu.VMEM((tb, C), jnp.float32)],
        ),
        compiler_params=pltpu.CompilerParams(
            dimension_semantics=("parallel", "arbitrary"),
            vmem_limit_bytes=vmem_limit,
        ),
    )(x, w1_t, w2_t)

    out = pl.pallas_call(
        _se_scale_kernel,
        out_shape=jax.ShapeDtypeStruct((B, C, L), x.dtype),
        grid_spec=pltpu.PrefetchScalarGridSpec(
            num_scalar_prefetch=0,
            grid=grid,
            in_specs=[
                pl.BlockSpec((tb, C, tl), lambda b, l: (b, 0, l)),
                pl.BlockSpec((tb, C, 1), lambda b, l: (b, 0, 0)),
            ],
            out_specs=pl.BlockSpec((tb, C, tl), lambda b, l: (b, 0, l)),
        ),
        compiler_params=pltpu.CompilerParams(
            dimension_semantics=("parallel", "parallel"),
            vmem_limit_bytes=vmem_limit,
        ),
    )(x, gate)
    return out


# --------------------------------------------------------------------------- #
# Public wrapper
# --------------------------------------------------------------------------- #
@partial(jax.jit, static_argnames=("force_two_pass",))
def se_module(x, w1, w2, *, force_two_pass=False):
    """Squeeze-and-Excitation forward.

    x : (B, C, L)   activation (PyTorch NCL layout), f32 or bf16
    w1: (C//r, C)   first Linear weight (PyTorch (out, in) layout, no bias)
    w2: (C, C//r)   second Linear weight (PyTorch (out, in) layout, no bias)
    returns (B, C, L):  x * sigmoid(relu(mean_L(x) @ w1.T) @ w2.T)[:, :, None]
    """
    B, C, L = x.shape
    Cr = w1.shape[0]
    itemsize = jnp.dtype(x.dtype).itemsize

    # Pre-transpose weights (no in-kernel .T / XLU relayout) and fold the 1/L of
    # the adaptive-avg-pool mean into W1 (positive scalar commutes through
    # Linear + ReLU).  1/L always uses the TRUE L even when we pad below.
    w1_t = (w1.T / jnp.float32(L)).astype(jnp.float32)                   # (C, Cr)
    w2_t = w2.T.astype(jnp.float32)                                      # (Cr, C)

    budget = _vmem_budget_bytes()
    weight_bytes = 4 * (C * Cr + Cr * C)
    slack = 2 * 1024 * 1024  # gate/accumulator scratch + pipeline bookkeeping

    # Lane-dense padded length (zeros don't change the L-sum).
    Lp = pl.cdiv(L, 128) * 128

    def stripe_fits(tb):
        stripe = tb * C * Lp * itemsize
        # double-buffered input + double-buffered output + resident weights
        return 4 * stripe + weight_bytes + slack <= budget

    # ---- Preferred path: fused single-pass kernel --------------------------
    tb_fused = None
    if not force_two_pass:
        divisors = [d for d in range(B, 0, -1) if B % d == 0]
        min_steps = min(4, B)  # keep >= 4 grid steps when possible
        for d in divisors:
            if stripe_fits(d) and B // d >= min_steps:
                tb_fused = d
                break
        if tb_fused is None:
            for d in divisors:  # small B: largest feasible stripe
                if stripe_fits(d):
                    tb_fused = d
                    break

    if tb_fused is not None:
        xp = x if Lp == L else jnp.pad(x, ((0, 0), (0, 0), (0, Lp - L)))
        out = _se_fused(xp, w1_t, w2_t, tb_fused, budget)
        return out if Lp == L else out[:, :, :L]

    # ---- Fallback: full-L stripe exceeds VMEM budget -> stream L tiles -----
    tl = max(128, ((budget - weight_bytes - slack) // (4 * C * itemsize)) // 128 * 128)
    tl = int(min(tl, Lp))
    Lq = pl.cdiv(L, tl) * tl
    xq = x if Lq == L else jnp.pad(x, ((0, 0), (0, 0), (0, Lq - L)))
    out = _se_two_pass(xq, w1_t, w2_t, 1, tl, budget)
    return out if Lq == L else out[:, :, :L]


# --------------------------------------------------------------------------- #
# Demo / self-check
# --------------------------------------------------------------------------- #
if __name__ == "__main__":
    # Small shapes consistent with UNet1DDecoder's SE usage (C=64 channels,
    # reduction=8); L a multiple of 128 so the stores stay lane-dense and the
    # fused grid has multiple B steps.
    B, C, L = 4, 64, 256
    reduction = 8
    Cr = C // reduction

    key = jax.random.PRNGKey(0)
    kx, k1, k2 = jax.random.split(key, 3)

    x = jax.random.normal(kx, (B, C, L), dtype=jnp.float32)
    # Deterministic Linear weights, PyTorch (out_features, in_features) convention.
    w1 = (jax.random.uniform(k1, (Cr, C), dtype=jnp.float32) - 0.5) * (2.0 / jnp.sqrt(C))
    w2 = (jax.random.uniform(k2, (C, Cr), dtype=jnp.float32) - 0.5) * (2.0 / jnp.sqrt(Cr))

    out = jax.block_until_ready(se_module(x, w1, w2))

    # Pure-JAX reference.
    pooled = jnp.mean(x, axis=-1)
    y_ref = jax.nn.sigmoid(jnp.maximum(pooled @ w1.T, 0.0) @ w2.T)
    ref = x * y_ref[:, :, None]

    assert out.shape == ref.shape and out.dtype == ref.dtype
    assert jnp.allclose(out, ref, atol=1e-3, rtol=1e-3), "fused kernel mismatch vs reference"

    # Also exercise the streaming two-pass fallback path (used when a full-L
    # stripe would exceed the VMEM budget) so it stays tested.
    out2 = jax.block_until_ready(se_module(x, w1, w2, force_two_pass=True))
    assert jnp.allclose(out2, ref, atol=1e-3, rtol=1e-3), "two-pass kernel mismatch vs reference"

    print("KERNEL_OK")
</pallas_src>

<mosaic_0001>
module attributes {stable_mosaic.version = 11 : i64} {
  func.func @_se_fused_kernel(%arg0: i32, %arg1: memref<1x64x256xf32, #tpu.memory_space<vmem>>, %arg2: memref<64x8xf32, #tpu.memory_space<vmem>>, %arg3: memref<8x64xf32, #tpu.memory_space<vmem>>, %arg4: memref<1x64x256xf32, #tpu.memory_space<vmem>>) attributes {dimension_semantics = [#tpu.dimension_semantics<parallel>], iteration_bounds = array<i64: 4>, scalar_prefetch = 0 : i64, scratch_operands = 0 : i64, tpu.core_type = #tpu.core_type<tc>, window_params = [{transform_indices = @transform_0, window_bounds = array<i64: 1, 64, 256>}, {pipeline_mode = #tpu.pipeline_mode<synchronous>, transform_indices = @transform_1, window_bounds = array<i64: 64, 8>}, {pipeline_mode = #tpu.pipeline_mode<synchronous>, transform_indices = @transform_2, window_bounds = array<i64: 8, 64>}, {transform_indices = @transform_3, window_bounds = array<i64: 1, 64, 256>}]} {
    %c0 = arith.constant 0 : index
    %c0_0 = arith.constant 0 : index
    %c0_1 = arith.constant 0 : index
    %0 = vector.load %arg1[%c0, %c0_0, %c0_1] : memref<1x64x256xf32, #tpu.memory_space<vmem>>, vector<1x64x256xf32>
    %cst = arith.constant dense<0.000000e+00> : vector<1x64xf32>
    %1 = vector.multi_reduction <add>, %0, %cst [2] : vector<1x64x256xf32> to vector<1x64xf32>
    %c0_2 = arith.constant 0 : index
    %c0_3 = arith.constant 0 : index
    %2 = vector.load %arg2[%c0_2, %c0_3] : memref<64x8xf32, #tpu.memory_space<vmem>>, vector<64x8xf32>
    %cst_4 = arith.constant dense<0.000000e+00> : vector<1x8xf32>
    %3 = tpu.matmul %1, %2, %cst_4 {dimension_numbers = #tpu.dot_dimension_numbers<[1], [0], [0], [1], [0, 0, 1, 1], [], []>} : vector<1x64xf32>, vector<64x8xf32>, vector<1x8xf32> -> vector<1x8xf32>
    %cst_5 = arith.constant 0.000000e+00 : f32
    %4 = vector.broadcast %cst_5 : f32 to vector<1x8xf32>
    %5 = arith.maximumf %3, %4 : vector<1x8xf32>
    %c0_6 = arith.constant 0 : index
    %c0_7 = arith.constant 0 : index
    %6 = vector.load %arg3[%c0_6, %c0_7] : memref<8x64xf32, #tpu.memory_space<vmem>>, vector<8x64xf32>
    %cst_8 = arith.constant dense<0.000000e+00> : vector<1x64xf32>
    %7 = tpu.matmul %5, %6, %cst_8 {dimension_numbers = #tpu.dot_dimension_numbers<[1], [0], [0], [1], [0, 0, 1, 1], [], []>} : vector<1x8xf32>, vector<8x64xf32>, vector<1x64xf32> -> vector<1x64xf32>
    %8 = arith.negf %7 : vector<1x64xf32>
    %9 = math.exp %8 : vector<1x64xf32>
    %cst_9 = arith.constant 1.000000e+00 : f32
    %10 = vector.broadcast %cst_9 : f32 to vector<1x64xf32>
    %11 = arith.addf %10, %9 : vector<1x64xf32>
    %12 = arith.divf %10, %11 : vector<1x64xf32>
    %13 = vector.shape_cast %12 : vector<1x64xf32> to vector<1x64x1xf32>
    %c0_10 = arith.constant 0 : index
    %c0_11 = arith.constant 0 : index
    %c0_12 = arith.constant 0 : index
    %14 = vector.load %arg1[%c0_10, %c0_11, %c0_12] : memref<1x64x256xf32, #tpu.memory_space<vmem>>, vector<1x64x256xf32>
    %15 = vector.broadcast %13 : vector<1x64x1xf32> to vector<1x64x256xf32>
    %16 = arith.mulf %14, %15 : vector<1x64x256xf32>
    %c0_13 = arith.constant 0 : index
    %c0_14 = arith.constant 0 : index
    %c0_15 = arith.constant 0 : index
    %17 = vector.load %arg4[%c0_13, %c0_14, %c0_15] : memref<1x64x256xf32, #tpu.memory_space<vmem>>, vector<1x64x256xf32>
    tpu.vector_store %arg4[%c0_13, %c0_14, %c0_15], %16 {strides = array<i32>} : memref<1x64x256xf32, #tpu.memory_space<vmem>>, vector<1x64x256xf32>,
    return
  }
  func.func @transform_0(%arg0: i32) -> (i32, i32, i32) {
    %c0_i32 = arith.constant 0 : i32
    %c0_i32_0 = arith.constant 0 : i32
    %c0_i32_1 = arith.constant 0 : i32
    return %arg0, %c0_i32, %c0_i32_0 : i32, i32, i32
  }
  func.func @transform_1(%arg0: i32) -> (i32, i32) {
    %c0_i32 = arith.constant 0 : i32
    %c0_i32_0 = arith.constant 0 : i32
    %c0_i32_1 = arith.constant 0 : i32
    return %c0_i32, %c0_i32_0 : i32, i32
  }
  func.func @transform_2(%arg0: i32) -> (i32, i32) {
    %c0_i32 = arith.constant 0 : i32
    %c0_i32_0 = arith.constant 0 : i32
    %c0_i32_1 = arith.constant 0 : i32
    return %c0_i32, %c0_i32_0 : i32, i32
  }
  func.func @transform_3(%arg0: i32) -> (i32, i32, i32) {
    %c0_i32 = arith.constant 0 : i32
    %c0_i32_0 = arith.constant 0 : i32
    %c0_i32_1 = arith.constant 0 : i32
    return %arg0, %c0_i32, %c0_i32_0 : i32, i32, i32
  }
}

</mosaic_0001>

<bundles_post_ra>
// kernel: se_module.1
= control target key start
LH: loop header
LB: loop body
LE: loop exit
PB: predicated region body
PF: predicated region fallthrough
CT: control target
= control target key end

     0   :  { %8 = vsyncpa [#allocation3], 0  ;;  %s1144_s0 = inlined_call_operand.hbm [shape: f32[4,64,256], index: 0, kind: input, shape index: {}]   ;;  %s1145_s1 = inlined_call_operand.vmem [shape: f32[64,8], index: 1, kind: input, shape index: {}]   ;;  %s1146_s2 = inlined_call_operand.vmem [shape: f32[8,64], index: 2, kind: input, shape index: {}]   ;;  %s1147_s3 = inlined_call_operand.hbm [shape: f32[4,64,256], index: 3, kind: output, shape index: {}]  }
   0x1   :  { %10 = vsyncpa [#allocation3 + $0x1], 0 }
   0x2   :  { %11 = vsyncpa [#allocation4], 0 }
   0x3   :  { %13 = vsyncpa [#allocation4 + $0x1], 0  ;;  %s859_s12 = smov 0   ;;  %s861_s13 = smov 0  }
   0x4   :  { %s863_s14 = smov 0   ;;  %s865_s15 = smov 0  }
   0x5 LB: > { %s880_s16 = sadd.s32 4294967295, %s828_s15   ;;  %s609_s17 = sadd.s32 4294967294, %s828_s15   ;;  %s828_s15 = sphi %s865_s15, %s1159_s15   ;;  %s824_s14 = sphi %s863_s14, %s1158_s14   ;;  %s820_s13 = sphi %s861_s13, %s1157_s13   ;;  %s816_s12 = sphi %s859_s12, %s1156_s12  }
   0x6   : > { %s884_s18 = sadd.s32 1, %s828_s15   ;;  %s26_s19 = sadd.s32 1, %s824_s14 }
   0x7   : > { %s23_s20 = ssub.s32 %s828_s15, %s884_s18  ;;  %p33_p0 = scmp.ne.s32.totalorder %s824_s14, %s820_s13 }
   0x8   : > { %p24_p1 = scmp.eq.s32.totalorder %s23_s20, 0  ;;  %p34_p2 = scmp.eq.s32.totalorder %s828_s15, 0 }
   0x9   : > { %p39_p3 = scmp.ne.s32.totalorder %s820_s13, %s816_s12  ;;  %p40_p4 = scmp.eq.s32.totalorder %s880_s16, 0 }
   0xa   : > { %s896_s21 = scalar_select %p24_p1, %s824_s14, %s26_s19  }
   0xb   : > { %p898_p5 = por %p34_p2, %p33_p0  ;;  %p902_p6 = por %p40_p4, %p39_p3 }
   0xc   : > { %p105_p7 = scmp.eq.s32.totalorder %s880_s16, 3  ;;  %p111_p8 = scmp.eq.s32.totalorder %s609_s17, 3 }
   0xd   : > { %p687_p9 = scmp.lt.s32.totalorder %s828_s15, 4  ;;  %s137_s26 = sand.u32 1, %s824_s14  }
   0xe   : > { %p908_p10 = por %p105_p7, %p33_p0  ;;  %p912_p11 = por %p111_p8, %p39_p3 }
   0xf   : > { %s626_s27 = sshll.u32 %s828_s15, 11  ;;  %s612_s28 = sshll.u32 %s137_s26, 7 }
  0x10   : > { %s1151_s24 = scalar_select %p908_p10, 1, 0 }
  0x11   : > { %s1152_s25 = scalar_select %p912_p11, 1, 0 }
  0x12   : > { %s921_s4 = scalar_lea.hbm %s1144_s0, %s626_s27  ;;  %s141_s5 = scalar_lea.vmem [#allocation2], %s612_s28 }
  0x13   : > { %s148_s6 = sshll.u32 %s141_s5, 4  ;;  %p925_p12 = pnand %p687_p9, %p898_p5  ;;  %s929_s6 = int_to_ptr.vmem [resolvable:$true] %s148_s6 }
  0x14   : > { %s931_s8 = scalar_lea.sflag [#allocation3], %s137_s26  ;;  %s732_s9 = scalar_lea.hbm %s921_s4, 2048 }
  0x15   : > { %p733_p13 = scmp.ne.s32.totalorder %s921_s4, %s732_s9  ;;  %p734_p0 = pneg %p925_p12 }
  0x16   : > { %s737_s17 = scalar_lea.hbm %s1144_s0, 8192  ;;  %p738_p3 = scmp.lt.u32.totalorder %s921_s4, %s1144_s0 }
  0x17   : > { %p735_p1 = pnand %p734_p0, %p733_p13  ;;  %p739_p4 = scmp.lt.u32.totalorder %s737_s17, %s732_s9 }
  0x18   : > { %p741_p7 = scmp.lt.u32.totalorder %s732_s9, %s921_s4 }
  0x19   : > { %p736_p2 = pneg %p735_p1  ;;  %p740_p5 = por %p739_p4, %p738_p3 }
  0x1b   : > { %p742_p8 = por %p741_p7, %p740_p5 }
  0x1d   : > { %p743_p9 = pnand %p742_p8, %p736_p2 }
  0x1f   : > { %746 = shalt.err (!%p743_p9)
}
  0x20   : > { %s747_s22 = scalar_lea.vmem %s929_s6, 2048  ;;  %s830_s26 = smov [#allocation2]  }
  0x21   : > { %p748_p13 = scmp.ne.s32.totalorder %s929_s6, %s747_s22  ;;  %s752_s27 = sshll.u32 %s830_s26, 4  ;;  %s753_s27 = int_to_ptr.vmem [resolvable:$false] %s752_s27 }
  0x22   : > { %s754_s28 = scalar_lea.vmem %s753_s27, 4096  ;;  %p755_p10 = scmp.lt.s32.totalorder %s929_s6, %s753_s27 }
  0x23   : > { %p750_p1 = pnand %p748_p13, %p734_p0  ;;  %p756_p3 = scmp.lt.s32.totalorder %s754_s28, %s747_s22 }
  0x25   : > { %p751_p11 = pneg %p750_p1  ;;  %p757_p4 = por %p756_p3, %p755_p10 }
  0x27   : > { %p758_p5 = pnand %p757_p4, %p751_p11 }
  0x29   : > { %761 = shalt.err (!%p758_p5)
}
  0x2a   : > { %s831_s29 = smov 256   ;;  %s832_s30 = smov 16  }
  0x2b   : > { %682 = dma.hbm_to_vmem [thread:$0]  (!%p925_p12), %s921_s4, 2048, %s929_s6, %s931_s8, %s831_s29, %s831_s29, %s832_s30  }
  0x2c   : > { %p615_p0 = scmp.ge.s32.totalorder %s828_s15, 1  ;;  %p156_p2 = scmp.lt.s32.totalorder %s828_s15, 5 }
  0x2e   : > { %p157_p7 = pnand %p615_p0, %p156_p2 }
  0x2f   : > { %s962_s5 = sand.u32 (!%p157_p7), 1, %s820_s13  }
  0x30   : > { %160 = sbr.rel (%p157_p7) target bundleno = 819 (0x333), region = 32  ;;  %s616_s9 = sshll.u32 (!%p157_p7), %s962_s5, 7 }
  0x31   : > { %s163_s10 = scalar_lea.sflag (!%p157_p7), [#allocation3], %s962_s5  ;;  %s166_s11 = scalar_lea.vmem (!%p157_p7), [#allocation2], %s616_s9 }
  0x37   : > { %807 = dma.done.wait (%p902_p6), %s163_s10, 2048  }
  0x38   : > { %809 = vsyncadd (%p902_p6), %s163_s10, 4294965248  ;;  %v972_v0 = vld [vmem:[%s166_s11] sm:$0xff]  ;;  %v974_v1 = vld [vmem:[%s166_s11 + $0x8] sm:$0xff]  ;;  %v833_v27 = vmov 0.0|0.0   ;;  %vm834_vm0 = vmmov 0   ;;  %v835_v37 = vmov 0.0   ;;  %v245_v38 = vlaneseq }
  0x39   : > { %v976_v2 = vld [vmem:[%s166_s11 + $0x20] sm:$0xff]  ;;  %v205_v3 = vadd.f32 %v974_v1, %v972_v0  ;;  %v980_v4 = vld [vmem:[%s166_s11 + $0x28] sm:$0xff]  ;;  %v982_v5 = vld [vmem:[%s166_s11 + $0x10] sm:$0xff]  ;;  %663 = vmatprep.subr.bf16.mxu0 %v833_v27  ;;  %655 = vmatprep.mubr.msk.f32.mxu0 %vm834_vm0, %v835_v37  ;;  %vm256_vm1 = vcmask 130112   ;;  %vm263_vm2 = vcmask 195712   ;;  %vm270_vm3 = vcmask 261312  }
  0x3a   : > { %v984_v6 = vld [vmem:[%s166_s11 + $0x18] sm:$0xff]  ;;  %v211_v7 = vadd.f32 %v980_v4, %v976_v2  ;;  %v988_v8 = vld [vmem:[%s166_s11 + $0x30] sm:$0xff]  ;;  %v996_v12 = vld [vmem:[%s166_s11 + $0x40] sm:$0xff]  ;;  %658 = vmatprep.subr.mxu1 %v835_v37  ;;  %660 = vmatprep.mubr.msk.f32.mxu1 %vm834_vm0, %v835_v37  ;;  %v246_v39 = vand.u32 127, %v245_v38  ;;  %v1044_v40 = vshrl.u32 %v245_v38, 7  ;;  %vm277_vm4 = vcmask 326912  }
  0x3b   : > { %v990_v9 = vld [vmem:[%s166_s11 + $0x38] sm:$0xff]  ;;  %206 = vadd.xlane.f32.xlu0 %v205_v3  ;;  %v208_v10 = vadd.f32 %v984_v6, %v982_v5  ;;  %v998_v13 = vld [vmem:[%s166_s11 + $0x48] sm:$0xff]  ;;  %v1000_v14 = vld [vmem:[%s166_s11 + $0x50] sm:$0xff]  ;;  %vm284_vm5 = vcmask 392512   ;;  %vm291_vm6 = vcmask 458112   ;;  %vm298_vm7 = vcmask 523712  }
  0x3c   : > { %212 = vadd.xlane.f32.xlu1 %v211_v7  ;;  %v214_v11 = vadd.f32 %v990_v9, %v988_v8  ;;  %v1002_v15 = vld [vmem:[%s166_s11 + $0x58] sm:$0xff]  ;;  %v217_v16 = vadd.f32 %v998_v13, %v996_v12  ;;  %v1008_v18 = vld [vmem:[%s166_s11 + $0x60] sm:$0xff]  ;;  %v1010_v19 = vld [vmem:[%s166_s11 + $0x68] sm:$0xff]  ;;  %v251_v41 = vadd.s32 4294967288, %v246_v39  ;;  %v258_v42 = vadd.s32 4294967280, %v246_v39  ;;  %s1064_s6 = scalar_lea.vmem [#allocation5], %s616_s9 }
  0x3d   : > { %v220_v17 = vadd.f32 %v1002_v15, %v1000_v14  ;;  %v1012_v20 = vld [vmem:[%s166_s11 + $0x70] sm:$0xff]  ;;  %v1014_v21 = vld [vmem:[%s166_s11 + $0x78] sm:$0xff]  ;;  %v223_v22 = vadd.f32 %v1010_v19, %v1008_v18  ;;  %v229_v24 = vld [vmem:[%s1145_s1] sm:$0xff]  ;;  %v265_v43 = vadd.s32 4294967272, %v246_v39  ;;  %v249_v45 = vsub.s32 %v246_v39, %v1044_v40  ;;  %s627_s9 = sshll.u32 %s880_s16, 11  ;;  %s536_s7 = sshll.u32 %s1064_s6, 4  ;;  %s1097_s7 = int_to_ptr.vmem [resolvable:$true] %s536_s7 }
  0x3e   : > { %v226_v23 = vadd.f32 %v1014_v21, %v1012_v20  ;;  %v230_v25 = vld [vmem:[%s1145_s1 + $0x8] sm:$0xff]  ;;  %v231_v28 = vld [vmem:[%s1145_s1 + $0x10] sm:$0xff]  ;;  %v232_v29 = vld [vmem:[%s1145_s1 + $0x18] sm:$0xff]  ;;  %v254_v47 = vsub.s32 %v251_v41, %v1044_v40  ;;  %v272_v48 = vadd.s32 4294967264, %v246_v39  ;;  %v261_v49 = vsub.s32 %v258_v42, %v1044_v40  ;;  %s1095_s19 = scalar_lea.hbm %s1147_s3, %s627_s9  ;;  %s523_s16 = scalar_lea.sflag [#allocation4], %s962_s5 }
  0x3f   : > { %209 = vadd.xlane.f32.xlu0 %v208_v10  ;;  %v664_v26 = vpack.c.bf16 %v230_v25, %v229_v24  ;;  %v667_v30 = vpack.c.bf16 %v232_v29, %v231_v28  ;;  %v233_v31 = vld [vmem:[%s1145_s1 + $0x20] sm:$0xff]  ;;  %v234_v32 = vld [vmem:[%s1145_s1 + $0x28] sm:$0xff]  ;;  %v235_v34 = vld [vmem:[%s1145_s1 + $0x30] sm:$0xff]  ;;  %v268_v50 = vsub.s32 %v265_v43, %v1044_v40  ;;  %v279_v51 = vadd.s32 4294967256, %v246_v39  ;;  %s762_s20 = scalar_lea.vmem %s1097_s7, 2048  ;;  %p1154_p10 = scmp.ne.s32.totalorder %s1151_s24, 0 }
  0x40   : > { %215 = vadd.xlane.f32.xlu1 %v214_v11  ;;  %v670_v33 = vpack.c.bf16 %v234_v32, %v233_v31  ;;  %v236_v35 = vld [vmem:[%s1145_s1 + $0x38] sm:$0xff]  ;;  %v275_v56 = vsub.s32 %v272_v48, %v1044_v40  ;;  %v286_v57 = vadd.s32 4294967248, %v246_v39  ;;  %v293_v61 = vadd.s32 4294967240, %v246_v39  ;;  %v374_v31 = vld [vmem:[%s1146_s2] sm:$0xff]  ;;  %p763_p6 = scmp.ne.s32.totalorder %s1097_s7, %s762_s20  ;;  %s836_s22 = smov [#allocation5]  }
  0x41   : > { %665 = vmatpush3.bf16.msra.mxu0 %v664_v26  ;;  %v673_v36 = vpack.c.bf16 %v236_v35, %v235_v34  ;;  %v282_v60 = vsub.s32 %v279_v51, %v1044_v40  ;;  %vm300_vm8 = vcmask 523264   ;;  %659 = vmatpush3.msra.mxu1 %v374_v31  ;;  %vm375_vm9 = vcmask 64512   ;;  %s766_s26 = sshll.u32 %s836_s22, 4  ;;  %s767_s26 = int_to_ptr.vmem [resolvable:$false] %s766_s26 }
  0x42   : > { %666 = vmatprep.subr.bf16.mxu0 %v833_v27  ;;  %v457_v41 = vsub.s32 0, %v1044_v40  ;;  %p764_p11 = pnand %p763_p6, %p1154_p10  ;;  %s768_s27 = scalar_lea.vmem %s767_s26, 4096 }
  0x43   : > { %218 = vadd.xlane.f32.xlu0 %v217_v16  ;;  %v289_v16 = vsub.s32 %v286_v57, %v1044_v40  ;;  %p769_p8 = scmp.lt.s32.totalorder %s1097_s7, %s767_s26  ;;  %p770_p9 = scmp.lt.s32.totalorder %s768_s27, %s762_s20 }
  0x44   : > { %221 = vadd.xlane.f32.xlu1 %v220_v17  ;;  %p765_p12 = pneg %p764_p11 }
  0x45   : > { %668 = vmatpush3.bf16.msra.mxu0 %v667_v30  ;;  %p771_p13 = por %p770_p9, %p769_p8 }
  0x46   : > { %669 = vmatprep.subr.bf16.mxu0 %v833_v27 }
  0x47   : > { %224 = vadd.xlane.f32.xlu0 %v223_v22  ;;  %v296_v22 = vsub.s32 %v293_v61, %v1044_v40  ;;  %p772_p1 = pnand %p771_p13, %p765_p12 }
  0x48   : > { %227 = vadd.xlane.f32.xlu1 %v226_v23 }
  0x49   : > { %671 = vmatpush3.bf16.msra.mxu0 %v670_v33 }
  0x4a   : > { %672 = vmatprep.subr.bf16.mxu0 %v833_v27 }
  0x4d   : > { %674 = vmatpush3.bf16.msra.mxu0 %v673_v36 }
  0xc8   : > { %v207_v44 = vpop.xlane.xlu0 %206 }
  0xc9   : > { %v213_v46 = vpop.xlane.xlu1 %212  ;;  %v250_v53 = vrot.slane %v207_v44, %v249_v45 }
  0xca   : > { %v262_v58 = vrot.slane %v213_v46, %v261_v49 }
  0xcc   : > { %v210_v52 = vpop.xlane.xlu0 %209 }
  0xcd   : > { %v255_v54 = vrot.slane %v210_v52, %v254_v47  ;;  %v216_v55 = vpop.xlane.xlu1 %215 }
  0xce   : > { %v269_v59 = vrot.slane %v216_v55, %v268_v50 }
  0xcf   : > { %v257_v62 = vsel %vm256_vm1, %v255_v54, %v250_v53 }
  0xd0   : > { %v264_v63 = vsel %vm263_vm2, %v262_v58, %v257_v62  ;;  %v219_v3 = vpop.xlane.xlu0 %218 }
  0xd1   : > { %v271_v7 = vsel %vm270_vm3, %v269_v59, %v264_v63  ;;  %v276_v10 = vrot.slane %v219_v3, %v275_v56  ;;  %v222_v11 = vpop.xlane.xlu1 %221 }
  0xd2   : > { %v283_v17 = vrot.slane %v222_v11, %v282_v60 }
  0xd3   : > { %v278_v23 = vsel %vm277_vm4, %v276_v10, %v271_v7 }
  0xd4   : > { %v225_v24 = vpop.xlane.xlu0 %224  ;;  %v285_v27 = vsel %vm284_vm5, %v283_v17, %v278_v23 }
  0xd5   : > { %v290_v25 = vrot.slane %v225_v24, %v289_v16  ;;  %v228_v26 = vpop.xlane.xlu1 %227 }
  0xd6   : > { %v297_v28 = vrot.slane %v228_v26, %v296_v22 }
  0xd7   : > { %v292_v29 = vsel %vm291_vm6, %v290_v25, %v285_v27 }
  0xd8   : > { %v299_v30 = vsel %vm298_vm7, %v297_v28, %v292_v29 }
  0xd9   : > { %656 = vmatmul.mubr.msk.f32.vlgmr.msra.gmra.mrb[0].mxu0 %vm300_vm8, %v299_v30 }
 0x1ac   : > { %v369_v32 = vpop.f32.mrb[0].mxu0 }
 0x1ad   : > { %v373_v33 = vmax.f32 %v369_v32, 0.0  ;;  %v657_v34 = vpop.f32.mrb[1].mxu0 }
 0x1af   : > { %661 = vmatmul.mubr.msk.f32.vlgmr.msra.gmra.mrb[0].mxu1 %vm375_vm9, %v373_v33 }
 0x282   : > { %v445_v35 = vpop.f32.mrb[0].mxu1 }
 0x283   : > { %v620_v36 = vmul.f32 -1.442695, %v445_v35  ;;  %v662_v37 = vpop.f32.mrb[1].mxu1 }
 0x285   : > { %728 = vpow2.f32 %v620_v36 }
 0x28f   : > { %v729_v38 = vpop.eup %728 }
 0x290   : > { %v452_v39 = vadd.f32 1.0, %v729_v38 }
 0x292   : > { %730 = vrcp.f32 %v452_v39 }
 0x29c   : > { %v731_v42 = vpop.eup %730 }
 0x29d   : > { %v458_v43 = vrot.slane %v731_v42, %v457_v41 }
 0x29f   : > { %464 = vbcast.lane.b32.xlu1 %v458_v43, 264  ;;  %460 = vbcast.lane.b32.xlu0 %v458_v43, 256 }
 0x2a3   : > { %468 = vbcast.lane.b32.xlu1 %v458_v43, 272  ;;  %476 = vbcast.lane.b32.xlu0 %v458_v43, 288 }
 0x2a7   : > { %472 = vbcast.lane.b32.xlu1 %v458_v43, 280  ;;  %484 = vbcast.lane.b32.xlu0 %v458_v43, 304 }
 0x2ab   : > { %480 = vbcast.lane.b32.xlu1 %v458_v43, 296 }
 0x2af   : > { %488 = vbcast.lane.b32.xlu1 %v458_v43, 312 }
 0x311   : > { %v465_v44 = vpop.permute.xlu1 %464  ;;  %v461_v45 = vpop.permute.xlu0 %460 }
 0x312   : > { %v492_v46 = vmul.f32 %v465_v44, %v982_v5  ;;  %v493_v47 = vmul.f32 %v465_v44, %v984_v6  ;;  %v490_v48 = vmul.f32 %v461_v45, %v972_v0  ;;  %v491_v40 = vmul.f32 %v461_v45, %v974_v1 }
 0x314   : > { %508 = vst [vmem:[%s1064_s6 + $0x10] sm:$0xff] %v492_v46  ;;  %509 = vst [vmem:[%s1064_s6 + $0x18] sm:$0xff] %v493_v47 }
 0x315   : > { %506 = vst [vmem:[%s1064_s6] sm:$0xff] %v490_v48  ;;  %507 = vst [vmem:[%s1064_s6 + $0x8] sm:$0xff] %v491_v40  ;;  %v469_v5 = vpop.permute.xlu1 %468  ;;  %v477_v0 = vpop.permute.xlu0 %476 }
 0x316   : > { %v494_v1 = vmul.f32 %v469_v5, %v976_v2  ;;  %v495_v6 = vmul.f32 %v469_v5, %v980_v4  ;;  %v498_v49 = vmul.f32 %v477_v0, %v996_v12  ;;  %v499_v50 = vmul.f32 %v477_v0, %v998_v13 }
 0x318   : > { %510 = vst [vmem:[%s1064_s6 + $0x20] sm:$0xff] %v494_v1  ;;  %511 = vst [vmem:[%s1064_s6 + $0x28] sm:$0xff] %v495_v6 }
 0x319   : > { %514 = vst [vmem:[%s1064_s6 + $0x40] sm:$0xff] %v498_v49  ;;  %515 = vst [vmem:[%s1064_s6 + $0x48] sm:$0xff] %v499_v50  ;;  %v473_v51 = vpop.permute.xlu1 %472  ;;  %v485_v52 = vpop.permute.xlu0 %484 }
 0x31a   : > { %v496_v2 = vmul.f32 %v473_v51, %v988_v8  ;;  %v497_v53 = vmul.f32 %v473_v51, %v990_v9  ;;  %v502_v4 = vmul.f32 %v485_v52, %v1008_v18  ;;  %v503_v12 = vmul.f32 %v485_v52, %v1010_v19 }
 0x31c   : > { %512 = vst [vmem:[%s1064_s6 + $0x30] sm:$0xff] %v496_v2  ;;  %513 = vst [vmem:[%s1064_s6 + $0x38] sm:$0xff] %v497_v53 }
 0x31d   : > { %518 = vst [vmem:[%s1064_s6 + $0x60] sm:$0xff] %v502_v4  ;;  %519 = vst [vmem:[%s1064_s6 + $0x68] sm:$0xff] %v503_v12  ;;  %v481_v13 = vpop.permute.xlu1 %480 }
 0x31e   : > { %v500_v54 = vmul.f32 %v481_v13, %v1000_v14  ;;  %v501_v55 = vmul.f32 %v481_v13, %v1002_v15 }
 0x320   : > { %516 = vst [vmem:[%s1064_s6 + $0x50] sm:$0xff] %v500_v54  ;;  %517 = vst [vmem:[%s1064_s6 + $0x58] sm:$0xff] %v501_v55 }
 0x321   : > { %v489_v8 = vpop.permute.xlu1 %488 }
 0x322   : > { %v504_v9 = vmul.f32 %v489_v8, %v1012_v20  ;;  %v505_v14 = vmul.f32 %v489_v8, %v1014_v21 }
 0x324   : > { %520 = vst [vmem:[%s1064_s6 + $0x70] sm:$0xff] %v504_v9  ;;  %521 = vst [vmem:[%s1064_s6 + $0x78] sm:$0xff] %v505_v14 }
 0x325   : > { %775 = shalt.err (!%p772_p1)
}
 0x326   : > { %s776_s28 = scalar_lea.hbm %s1095_s19, 2048  ;;  %s780_s10 = scalar_lea.hbm %s1147_s3, 8192 }
 0x327   : > { %p777_p3 = scmp.ne.s32.totalorder %s1095_s19, %s776_s28  ;;  %p781_p0 = scmp.lt.u32.totalorder %s1095_s19, %s1147_s3 }
 0x328   : > { %p782_p2 = scmp.lt.u32.totalorder %s780_s10, %s776_s28  ;;  %p784_p6 = scmp.lt.u32.totalorder %s776_s28, %s1095_s19 }
 0x329   : > { %p778_p4 = pnand %p777_p3, %p1154_p10 }
 0x32a   : > { %p783_p7 = por %p782_p2, %p781_p0 }
 0x32b   : > { %p779_p5 = pneg %p778_p4 }
 0x32c   : > { %p785_p11 = por %p784_p6, %p783_p7 }
 0x32e   : > { %p786_p12 = pnand %p785_p11, %p779_p5 }
 0x330   : > { %789 = shalt.err (!%p786_p12)
}
 0x331   : > { %s837_s4 = smov 256   ;;  %s838_s6 = smov 16  }
 0x332   : > { %677 = dma.vmem_to_hbm [thread:$0]  (%p1154_p10), %s1097_s7, 2048, %s1095_s19, %s523_s16, %s837_s4, %s837_s4, %s838_s6  }
 0x333 PF: > { %p688_p8 = scmp.ge.s32.totalorder %s828_s15, 2  ;;  %s551_s9 = sand.u32 1, %s816_s12  }
 0x334   : > { %p1155_p9 = scmp.ne.s32.totalorder %s1152_s25, 0  ;;  %s552_s8 = scalar_lea.sflag [#allocation4], %s551_s9 }
 0x336   : > { %p684_p13 = pnand %p688_p8, %p1155_p9 }
 0x338   : > { %811 = dma.done.wait (!%p684_p13), %s552_s8, 2048  }
 0x339   : > { %813 = vsyncadd (!%p684_p13), %s552_s8, 4294965248  ;;  %p16_p1 = scmp.ge.s32.totalorder %s884_s18, 6   ;;  %s1156_s12 = smov %s820_s13 }
 0x33a   : > { %s1157_s13 = smov %s824_s14  ;;  %s1158_s14 = smov %s896_s21 }
 0x33b   : > { %s1159_s15 = smov %s884_s18  ;;  %18 = sbr.rel (!%p16_p1) target bundleno = 5 (0x5), region = 77 }
 0x342   :  { %557 = vsyncpa [#allocation3], 1 }
 0x343   :  { %559 = vsyncpa [#allocation3 + $0x1], 1 }
 0x344   :  { %560 = vsyncpa [#allocation4], 1 }
 0x345   :  { %562 = vsyncpa [#allocation4 + $0x1], 1 }

</bundles_post_ra>
